<compile_context>
chip_gen: v5e
topology: v5e:2x2
jax: 0.10.0
libtpu: 0.0.40
codegen_flags: <defaults>
</compile_context>

<pallas_src>
import functools

import numpy as np
import jax
import jax.numpy as jnp
from jax.experimental import pallas as pl
from jax.experimental.pallas import tpu as pltpu


# ---------------------------------------------------------------------------
# Sizes / padding constants
# ---------------------------------------------------------------------------
C2_PAD = 64                      # conv2 Cout padded 50 -> 64 (lane friendly)
FC1_PAD = 256                    # fused fc1 width (100 class + 100 domain + 56 pad)
FC2_PAD = 128                    # class fc2 width padded 100 -> 128
OUT_PAD = 128                    # final logit buffers padded to one full vreg of lanes
FEAT_TORCH = 50 * 13 * 13        # PyTorch flatten size
FEAT_PAD = 13 * 13 * C2_PAD      # our NHWC flatten size (padded channels are zero)

_TILE_ROWS = 4 * 6 * 32          # 768 grouped im2col rows per pool-row-group (4 quarters x 192)
_FRAME_ROWS = 30 * 32            # 960 rows of the 32-wide pool1 frame per image
_C2_ROWS = 26 * 32               # 832 conv2 output rows per image (cols w>=26 are discarded)
_NEG = -1e9                      # bias for padded logit lanes


# ---------------------------------------------------------------------------
# pltpu.roll direction probe (resolved once, eagerly, outside any jit trace)
# ---------------------------------------------------------------------------
@functools.lru_cache(maxsize=None)
def _roll_moves_to_higher_indices() -> bool:
    """True iff pltpu.roll(x, shift=1, axis=0)[i] == x[i-1] (jnp.roll semantics)."""
    def probe(x_ref, o_ref):
        o_ref[...] = pltpu.roll(x_ref[...], shift=1, axis=0)

    x = jnp.tile(jnp.arange(8, dtype=jnp.float32)[:, None], (1, 128))
    out = pl.pallas_call(probe, out_shape=jax.ShapeDtypeStruct((8, 128), jnp.float32))(x)
    v = float(out[0, 0])
    if v == 7.0:
        return True
    if v == 1.0:
        return False
    raise RuntimeError(f"unexpected pltpu.roll behaviour (probe value {v})")


def _shift_up_rows(v, k):
    """out[i] = v[(i + k) % n] along axis 0 (k is a static python int)."""
    if k == 0:
        return v
    n = v.shape[0]
    shift = (n - k) if _roll_moves_to_higher_indices() else k
    return pltpu.roll(v, shift=shift, axis=0)


# ---------------------------------------------------------------------------
# Kernel 1: conv1 (1->64, k=5) + folded bn1 + relu + 2x2 maxpool, fused
# ---------------------------------------------------------------------------
def _conv1_pool_kernel(x_ref, w_ref, s_ref, b_ref, o_ref):
    # x_ref: (3840, 32) bf16 grouped im2col rows of one image
    # w_ref: (32, 64) bf16 (25 real taps + 7 zero rows), s/b: (1, 64) folded bn
    # o_ref: (960, 64) bf16 -- pool1 output laid out as a 32-wide frame (row = h*32 + w)
    for t in range(5):                                   # 5 groups of 6 pooled rows
        xt = x_ref[pl.ds(t * _TILE_ROWS, _TILE_ROWS), :]
        acc = jnp.dot(xt, w_ref[...], preferred_element_type=jnp.float32)   # (768, 64)
        y = jnp.maximum(acc * s_ref[...] + b_ref[...], 0.0)
        # the 4 aligned 192-row quarters are the 4 members of each 2x2 pool window
        pooled = jnp.maximum(jnp.maximum(y[0:192], y[192:384]),
                             jnp.maximum(y[384:576], y[576:768]))           # (192, 64)
        o_ref[pl.ds(t * 192, 192), :] = pooled.astype(o_ref.dtype)


def conv1_bn_relu_pool(cols, w, s, b):
    bsz = cols.shape[0]
    return pl.pallas_call(
        _conv1_pool_kernel,
        out_shape=jax.ShapeDtypeStruct((bsz, _FRAME_ROWS, 64), jnp.bfloat16),
        grid=(bsz,),
        in_specs=[
            pl.BlockSpec((None, 5 * _TILE_ROWS, 32), lambda i: (i, 0, 0)),
            pl.BlockSpec((32, 64), lambda i: (0, 0)),
            pl.BlockSpec((1, 64), lambda i: (0, 0)),
            pl.BlockSpec((1, 64), lambda i: (0, 0)),
        ],
        out_specs=pl.BlockSpec((None, _FRAME_ROWS, 64), lambda i: (i, 0, 0)),
        compiler_params=pltpu.CompilerParams(dimension_semantics=("parallel",)),
    )(cols, w, s, b)


def _conv1_im2col(x):
    """x: (B, 64, 64, 1) bf16 -> (B, 3840, 32) im2col rows, grouped so that each 768-row
    group holds the four 2x2-pool-window members in four 192-row quarters (row = hl*32+wp,
    wp=30,31 are zero dummies that only feed discarded frame columns)."""
    b = x.shape[0]
    cols = [x[:, kh:kh + 60, kw:kw + 60, 0] for kh in range(5) for kw in range(5)]
    patches = jnp.stack(cols, axis=-1)                              # (B, 60, 60, 25)
    patches = jnp.pad(patches, ((0, 0), (0, 0), (0, 4), (0, 7)))    # (B, 60, 64, 32)
    patches = patches.reshape(b, 5, 6, 2, 32, 2, 32)                # (b, t, hl, pr, wp, pc, k)
    patches = jnp.transpose(patches, (0, 1, 3, 5, 2, 4, 6))         # (b, t, pr, pc, hl, wp, k)
    return patches.reshape(b, 5 * _TILE_ROWS, 32)


# ---------------------------------------------------------------------------
# Kernel 2: conv2 (64->50, k=5) + folded bn2 + relu + 2x2 maxpool, fused
# ---------------------------------------------------------------------------
def _conv2_pool_kernel(x_ref, w_ref, s_ref, b_ref, sel_ref, o_ref):
    # x_ref  : (960, 64) bf16 pool1 frame (row = h*32 + w, h < 30; w=30,31 hold dummies)
    # w_ref  : (5, 64, 320) bf16; [kh, cin, kw*64 + cout] (cout padded to 64)
    # sel_ref: (169, 832) bf16 0/1 matrix selecting pooled rows 64*i + 2*j
    # o_ref  : (169, 64) bf16 pooled features, row = i*13 + j (NHWC flatten order)
    acc = jnp.zeros((_C2_ROWS, C2_PAD), jnp.float32)
    for kh in range(5):
        xk = x_ref[pl.ds(kh * 32, _C2_ROWS), :]                        # aligned (832, 64)
        prod = jnp.dot(xk, w_ref[kh], preferred_element_type=jnp.float32)   # (832, 320)
        for kw in range(5):
            tap = prod[:, kw * C2_PAD:(kw + 1) * C2_PAD]               # (832, 64)
            acc = acc + _shift_up_rows(tap, kw)                        # frame row p+kh*32+kw
    y = jnp.maximum(acc * s_ref[...] + b_ref[...], 0.0)                # cols w>=26 are garbage
    ym = jnp.maximum(y, _shift_up_rows(y, 1))                          # pool pair along w
    ym = jnp.maximum(ym, _shift_up_rows(ym, 32))                       # pool pair along h
    pooled = jnp.dot(sel_ref[...], ym.astype(jnp.bfloat16),
                     preferred_element_type=jnp.float32)               # exact row gather
    o_ref[...] = pooled.astype(o_ref.dtype)


def _pool2_select_matrix():
    rows = np.arange(169)
    tgt = 64 * (rows // 13) + 2 * (rows % 13)
    sel = np.zeros((169, _C2_ROWS), np.float32)
    sel[rows, tgt] = 1.0
    return jnp.asarray(sel, dtype=jnp.bfloat16)


def conv2_bn_relu_pool(frame, w, s, b):
    bsz = frame.shape[0]
    sel = _pool2_select_matrix()
    return pl.pallas_call(
        _conv2_pool_kernel,
        out_shape=jax.ShapeDtypeStruct((bsz, 169, C2_PAD), jnp.bfloat16),
        grid=(bsz,),
        in_specs=[
            pl.BlockSpec((None, _FRAME_ROWS, 64), lambda i: (i, 0, 0)),
            pl.BlockSpec((5, 64, 5 * C2_PAD), lambda i: (0, 0, 0)),
            pl.BlockSpec((1, C2_PAD), lambda i: (0, 0)),
            pl.BlockSpec((1, C2_PAD), lambda i: (0, 0)),
            pl.BlockSpec((169, _C2_ROWS), lambda i: (0, 0)),
        ],
        out_specs=pl.BlockSpec((None, 169, C2_PAD), lambda i: (i, 0, 0)),
        compiler_params=pltpu.CompilerParams(dimension_semantics=("parallel",)),
    )(frame, w, s, b, sel)


# ---------------------------------------------------------------------------
# Kernel 3: fused classifier (both heads, weights resident, log-softmax inside)
# ---------------------------------------------------------------------------
def _log_softmax(x):
    m = jnp.max(x, axis=-1, keepdims=True)
    e = jnp.exp(x - m)
    return x - m - jnp.log(jnp.sum(e, axis=-1, keepdims=True))


def _classifier_kernel(feat_ref, w1_ref, s1_ref, b1_ref,
                       cw2_ref, cs2_ref, cb2_ref, cw3_ref, cb3_ref,
                       dw2_ref, db2_ref, cls_ref, dom_ref):
    f = feat_ref[...]                                                       # (tb, 10816) bf16
    h1 = jnp.dot(f, w1_ref[...], preferred_element_type=jnp.float32)        # fused fc1 both heads
    h1 = jnp.maximum(h1 * s1_ref[...] + b1_ref[...], 0.0)
    h1b = h1.astype(jnp.bfloat16)
    # class head: fc2 + bn2 + relu, fc3, log-softmax (padded lanes carry -1e9 bias)
    h2 = jnp.dot(h1b, cw2_ref[...], preferred_element_type=jnp.float32)
    h2 = jnp.maximum(h2 * cs2_ref[...] + cb2_ref[...], 0.0)
    h3 = jnp.dot(h2.astype(jnp.bfloat16), cw3_ref[...],
                 preferred_element_type=jnp.float32) + cb3_ref[...]
    cls_ref[...] = _log_softmax(h3)
    # domain head: fc2, log-softmax
    d2 = jnp.dot(h1b, dw2_ref[...], preferred_element_type=jnp.float32) + db2_ref[...]
    dom_ref[...] = _log_softmax(d2)


def _pick_tb(b, cap=256):
    cands = [d for d in range(8, min(b, cap) + 1, 8) if b % d == 0]
    return max(cands) if cands else b


def classifier_heads(feat, p):
    bsz, kdim = feat.shape
    tb = _pick_tb(bsz)

    def rep(shape):
        nd = len(shape)
        return pl.BlockSpec(shape, lambda i, _nd=nd: (0,) * _nd)

    cls, dom = pl.pallas_call(
        _classifier_kernel,
        out_shape=(jax.ShapeDtypeStruct((bsz, OUT_PAD), jnp.float32),
                   jax.ShapeDtypeStruct((bsz, OUT_PAD), jnp.float32)),
        grid=(bsz // tb,),
        in_specs=[
            pl.BlockSpec((tb, kdim), lambda i: (i, 0)),
            rep((kdim, FC1_PAD)), rep((1, FC1_PAD)), rep((1, FC1_PAD)),
            rep((FC1_PAD, FC2_PAD)), rep((1, FC2_PAD)), rep((1, FC2_PAD)),
            rep((FC2_PAD, OUT_PAD)), rep((1, OUT_PAD)),
            rep((FC1_PAD, OUT_PAD)), rep((1, OUT_PAD)),
        ],
        out_specs=(pl.BlockSpec((tb, OUT_PAD), lambda i: (i, 0)),
                   pl.BlockSpec((tb, OUT_PAD), lambda i: (i, 0))),
        compiler_params=pltpu.CompilerParams(
            dimension_semantics=("parallel",),
            vmem_limit_bytes=40 * 1024 * 1024),
    )(feat, p['w1c'], p['s1c'], p['b1c'],
      p['c_w2'], p['c_s2'], p['c_b2'], p['c_w3'], p['c_b3'],
      p['d_w2'], p['d_b2'])
    return cls[:, :10], dom[:, :2]


# ---------------------------------------------------------------------------
# Parameter setup (packed kernel params + original-layout reference params)
# ---------------------------------------------------------------------------
def init_params(key):
    _roll_moves_to_higher_indices()         # prime the roll-direction probe outside jit
    ks = iter(jax.random.split(key, 48))

    def nrm(shape, s=0.1):
        return s * jax.random.normal(next(ks), shape, jnp.float32)

    def bn(c):
        gamma = 1.0 + nrm((c,))
        beta = nrm((c,))
        mean = nrm((c,))
        var = 1.0 + 0.1 * jax.random.uniform(next(ks), (c,), jnp.float32)
        return gamma, beta, mean, var

    def fold(bn_params, lin_bias, eps=1e-5):
        # eval-mode BatchNorm folded into a per-channel scale/bias applied post-matmul
        gamma, beta, mean, var = bn_params
        s = gamma / jnp.sqrt(var + eps)
        return s, beta + s * (lin_bias - mean)

    def linear(din, dout):
        w = (din ** -0.5) * jax.random.normal(next(ks), (din, dout), jnp.float32)
        b = nrm((dout,))
        return w, b

    # ---- raw parameters (PyTorch layouts) -------------------------------
    w1_oihw = nrm((64, 1, 5, 5)); b1 = nrm((64,))
    s1, bb1 = fold(bn(64), b1)
    w2_oihw = nrm((50, 64, 5, 5)); b2 = nrm((50,))
    s2, bb2 = fold(bn(50), b2)

    c_w1, c_lb1 = linear(FEAT_TORCH, 100); c_s1, c_b1 = fold(bn(100), c_lb1)
    c_w2, c_lb2 = linear(100, 100);        c_s2, c_b2 = fold(bn(100), c_lb2)
    c_w3, c_b3 = linear(100, 10)
    d_w1, d_lb1 = linear(FEAT_TORCH, 100); d_s1, d_b1 = fold(bn(100), d_lb1)
    d_w2, d_b2 = linear(100, 2)

    w1_hwio = jnp.transpose(w1_oihw, (2, 3, 1, 0))               # (5,5,1,64)
    w2_hwio = jnp.transpose(w2_oihw, (2, 3, 1, 0))               # (5,5,64,50)

    # ---- packed kernel parameters ----------------------------------------
    p = {}
    p['w1'] = jnp.pad(w1_hwio.reshape(25, 64), ((0, 7), (0, 0))).astype(jnp.bfloat16)
    p['s1'] = s1.reshape(1, 64)
    p['b1'] = bb1.reshape(1, 64)

    w2p = jnp.pad(w2_hwio, ((0, 0), (0, 0), (0, 0), (0, C2_PAD - 50)))     # (5,5,64,64)
    p['w2'] = jnp.transpose(w2p, (0, 2, 1, 3)).reshape(5, 64, 5 * C2_PAD).astype(jnp.bfloat16)
    p['s2'] = jnp.pad(s2, (0, C2_PAD - 50)).reshape(1, C2_PAD)
    p['b2'] = jnp.pad(bb2, (0, C2_PAD - 50)).reshape(1, C2_PAD)

    def chw_rows_to_hwc_rows(w):
        # PyTorch flattens the (50,13,13) feature as (c,h,w); our feature flattens as
        # (h,w,c_pad64).  Permute + zero-pad the fc1 rows once at init.
        w = w.reshape(50, 13, 13, -1)
        w = jnp.transpose(w, (1, 2, 0, 3))
        w = jnp.pad(w, ((0, 0), (0, 0), (0, C2_PAD - 50), (0, 0)))
        return w.reshape(FEAT_PAD, -1)

    w1c = jnp.concatenate([chw_rows_to_hwc_rows(c_w1), chw_rows_to_hwc_rows(d_w1)], axis=1)
    p['w1c'] = jnp.pad(w1c, ((0, 0), (0, FC1_PAD - 200))).astype(jnp.bfloat16)
    p['s1c'] = jnp.pad(jnp.concatenate([c_s1, d_s1]), (0, FC1_PAD - 200)).reshape(1, FC1_PAD)
    p['b1c'] = jnp.pad(jnp.concatenate([c_b1, d_b1]), (0, FC1_PAD - 200)).reshape(1, FC1_PAD)

    p['c_w2'] = jnp.zeros((FC1_PAD, FC2_PAD), jnp.float32).at[0:100, 0:100].set(c_w2).astype(jnp.bfloat16)
    p['c_s2'] = jnp.pad(c_s2, (0, FC2_PAD - 100)).reshape(1, FC2_PAD)
    p['c_b2'] = jnp.pad(c_b2, (0, FC2_PAD - 100)).reshape(1, FC2_PAD)
    p['c_w3'] = jnp.zeros((FC2_PAD, OUT_PAD), jnp.float32).at[0:100, 0:10].set(c_w3).astype(jnp.bfloat16)
    p['c_b3'] = jnp.full((1, OUT_PAD), _NEG, jnp.float32).at[0, 0:10].set(c_b3)
    p['d_w2'] = jnp.zeros((FC1_PAD, OUT_PAD), jnp.float32).at[100:200, 0:2].set(d_w2).astype(jnp.bfloat16)
    p['d_b2'] = jnp.full((1, OUT_PAD), _NEG, jnp.float32).at[0, 0:2].set(d_b2)

    # ---- reference (pure-JAX, original layouts) ---------------------------
    r = dict(w1=w1_hwio.astype(jnp.bfloat16), s1=s1, b1=bb1,
             w2=w2_hwio.astype(jnp.bfloat16), s2=s2, b2=bb2,
             c_w1=c_w1, c_s1=c_s1, c_b1=c_b1, c_w2=c_w2, c_s2=c_s2, c_b2=c_b2,
             c_w3=c_w3, c_b3=c_b3,
             d_w1=d_w1, d_s1=d_s1, d_b1=d_b1, d_w2=d_w2, d_b2=d_b2)
    return p, r


# ---------------------------------------------------------------------------
# Forward pass (Pallas) and pure-JAX reference
# ---------------------------------------------------------------------------
def cnn_forward(params, x, alpha):
    """x: (B, 1, 64, 64) NCHW (H=W=64 is implied by the 50*13*13 flatten).
    alpha only affects gradients (ReverseLayerF) so it is unused in the forward pass."""
    bsz = x.shape[0]
    w = x.shape[3]
    x = jnp.broadcast_to(x, (bsz, 1, w, w))                     # input_data.expand(B,1,W,W)
    x = jnp.transpose(x, (0, 2, 3, 1)).astype(jnp.bfloat16)     # NCHW -> NHWC

    cols = _conv1_im2col(x)                                                      # (B, 3840, 32)
    frame = conv1_bn_relu_pool(cols, params['w1'], params['s1'], params['b1'])   # (B, 960, 64)
    feat = conv2_bn_relu_pool(frame, params['w2'], params['s2'], params['b2'])   # (B, 169, 64)
    feat = feat.reshape(bsz, FEAT_PAD)
    # f_drop1 / c_drop1 (Dropout): eval-mode identity.  ReverseLayerF: forward identity.
    return classifier_heads(feat, params)


def reference_forward(rp, x, alpha):
    """Pure-JAX mirror of the pipeline (same bf16 rounding points) for validation."""
    del alpha
    bsz, _, _, w = x.shape
    x = jnp.broadcast_to(x, (bsz, 1, w, w))
    x = jnp.transpose(x, (0, 2, 3, 1)).astype(jnp.bfloat16)

    dn1 = jax.lax.conv_dimension_numbers(x.shape, rp['w1'].shape, ('NHWC', 'HWIO', 'NHWC'))
    y1 = jax.lax.conv_general_dilated(x, rp['w1'], (1, 1), 'VALID', dimension_numbers=dn1,
                                      preferred_element_type=jnp.float32)
    y1 = jnp.maximum(y1 * rp['s1'] + rp['b1'], 0.0)
    y1 = jnp.max(y1.reshape(bsz, 30, 2, 30, 2, 64), axis=(2, 4)).astype(jnp.bfloat16)

    dn2 = jax.lax.conv_dimension_numbers(y1.shape, rp['w2'].shape, ('NHWC', 'HWIO', 'NHWC'))
    y2 = jax.lax.conv_general_dilated(y1, rp['w2'], (1, 1), 'VALID', dimension_numbers=dn2,
                                      preferred_element_type=jnp.float32)
    y2 = jnp.maximum(y2 * rp['s2'] + rp['b2'], 0.0)
    y2 = jnp.max(y2.reshape(bsz, 13, 2, 13, 2, 50), axis=(2, 4)).astype(jnp.bfloat16)

    feat = jnp.transpose(y2, (0, 3, 1, 2)).reshape(bsz, FEAT_TORCH)       # (c,h,w) flatten

    def dot(a, wmat):
        return jnp.dot(a, wmat.astype(jnp.bfloat16), preferred_element_type=jnp.float32)

    h = jnp.maximum(dot(feat, rp['c_w1']) * rp['c_s1'] + rp['c_b1'], 0.0).astype(jnp.bfloat16)
    h2 = jnp.maximum(dot(h, rp['c_w2']) * rp['c_s2'] + rp['c_b2'], 0.0).astype(jnp.bfloat16)
    cls = jax.nn.log_softmax(dot(h2, rp['c_w3']) + rp['c_b3'], axis=-1)

    d = jnp.maximum(dot(feat, rp['d_w1']) * rp['d_s1'] + rp['d_b1'], 0.0).astype(jnp.bfloat16)
    dom = jax.nn.log_softmax(dot(d, rp['d_w2']) + rp['d_b2'], axis=-1)
    return cls, dom


if __name__ == "__main__":
    key = jax.random.PRNGKey(0)
    pkey, xkey = jax.random.split(key)
    _roll_moves_to_higher_indices()            # resolve roll direction eagerly, before jit
    params, ref_params = init_params(pkey)

    x = jax.random.normal(xkey, (2, 1, 64, 64), jnp.float32)
    alpha = jnp.float32(0.5)

    fwd = jax.jit(cnn_forward)
    class_out, domain_out = fwd(params, x, alpha)
    jax.block_until_ready((class_out, domain_out))

    assert class_out.shape == (2, 10), class_out.shape
    assert domain_out.shape == (2, 2), domain_out.shape
    assert bool(jnp.all(jnp.isfinite(class_out))) and bool(jnp.all(jnp.isfinite(domain_out)))
    # log-softmax rows must normalise
    assert bool(jnp.allclose(jnp.sum(jnp.exp(class_out), axis=1), 1.0, atol=1e-3))
    assert bool(jnp.allclose(jnp.sum(jnp.exp(domain_out), axis=1), 1.0, atol=1e-3))

    # end-to-end check against a pure-JAX reference with the same bf16 rounding points
    cls_expect, dom_expect = reference_forward(ref_params, x, alpha)
    assert bool(jnp.allclose(class_out, cls_expect, atol=7e-2, rtol=7e-2)), (
        float(jnp.max(jnp.abs(class_out - cls_expect))))
    assert bool(jnp.allclose(domain_out, dom_expect, atol=7e-2, rtol=7e-2)), (
        float(jnp.max(jnp.abs(domain_out - dom_expect))))

    print("KERNEL_OK")
</pallas_src>

<mosaic_0001>
module attributes {stable_mosaic.version = 11 : i64} {
  func.func @probe(%arg0: memref<8x128xf32, #tpu.memory_space<vmem>>, %arg1: memref<8x128xf32, #tpu.memory_space<vmem>>) attributes {dimension_semantics = [], scalar_prefetch = 0 : i64, scratch_operands = 0 : i64, tpu.core_type = #tpu.core_type<tc>} {
    %c0 = arith.constant 0 : index
    %c0_0 = arith.constant 0 : index
    %0 = vector.load %arg0[%c0, %c0_0] : memref<8x128xf32, #tpu.memory_space<vmem>>, vector<8x128xf32>
    %c1_i32 = arith.constant 1 : i32
    %1 = tpu.dynamic_rotate %0 by %c1_i32 dim 0 : vector<8x128xf32>, i32 -> vector<8x128xf32>
    %c0_1 = arith.constant 0 : index
    %c0_2 = arith.constant 0 : index
    %2 = vector.load %arg1[%c0_1, %c0_2] : memref<8x128xf32, #tpu.memory_space<vmem>>, vector<8x128xf32>
    tpu.vector_store %arg1[%c0_1, %c0_2], %1 {strides = array<i32>} : memref<8x128xf32, #tpu.memory_space<vmem>>, vector<8x128xf32>,
    return
  }
}

</mosaic_0001>

<bundles_post_ra>
// kernel: tpu_custom_call.1
= control target key start
LH: loop header
LB: loop body
LE: loop exit
PB: predicated region body
PF: predicated region fallthrough
CT: control target
= control target key end

     0   :  { %6 = vsyncpa [#allocation3], 0  ;;  %s115_s0 = inlined_call_operand.hbm [shape: f32[8,128], index: 0, kind: input, shape index: {}]   ;;  %s116_s1 = inlined_call_operand.hbm [shape: f32[8,128], index: 1, kind: output, shape index: {}]  }
   0x1   :  { %7 = vsyncpa [#allocation4], 0  ;;  %s13_s8 = sshll.u32 %s115_s0, 4  ;;  %s97_s9 = smov [#allocation2]   ;;  %s14_s8 = int_to_ptr.hbm [resolvable:$true] %s13_s8 }
   0x2   :  { %s15_s10 = sshll.u32 %s97_s9, 4  ;;  %s16_s10 = int_to_ptr.vmem [resolvable:$true] %s15_s10 }
   0x3   :  { %18 = dma.hbm_to_vmem [thread:$0]  %s14_s8, 128, %s16_s10, [#allocation3]  }
   0x4   :  { %93 = dma.done.wait [#allocation3], 128  }
   0x5   :  { %94 = vsyncadd [#allocation3], 4294967168  ;;  %s98_s11 = smov [#allocation5]   ;;  %s33_s15 = sshll.u32 %s116_s1, 4  ;;  %v23_v0 = vld [vmem:[#allocation2] sm:$0xff]  ;;  %s34_s15 = int_to_ptr.hbm [resolvable:$true] %s33_s15 }
   0x6   :  { %s31_s12 = sshll.u32 %s98_s11, 4  ;;  %v24_v1 = vrot.slane %v23_v0, 7  ;;  %s32_s12 = int_to_ptr.vmem [resolvable:$true] %s31_s12 }
   0x8   :  { %25 = vst [vmem:[#allocation5] sm:$0xff] %v24_v1 }
   0x9   :  { %36 = dma.vmem_to_hbm [thread:$0]  %s32_s12, 128, %s34_s15, [#allocation4]  }
   0xa   :  { %95 = dma.done.wait [#allocation4], 128  }
   0xb   :  { %96 = vsyncadd [#allocation4], 4294967168 }
   0xc   :  { %41 = vsyncpa [#allocation3], 1 }
   0xd   :  { %42 = vsyncpa [#allocation4], 1 }

</bundles_post_ra>
